<compile_context>
chip_gen: v7x
topology: tpu7x:2x2x1
jax: 0.10.0
libtpu: 0.0.40
codegen_flags: <defaults>
</compile_context>

<pallas_src>
import jax
import jax.numpy as jnp
from jax.experimental import pallas as pl
from jax.experimental.pallas import tpu as pltpu

LN_EPS = 1e-5
_LANE = 128


def _round_up(a, b):
    return ((a + b - 1) // b) * b


def _output_process_kernel(x_ref, gamma_ref, beta_ref, w1_ref, b1_ref,
                           w2_ref, b2_ref, o_ref):
    """Fused LayerNorm -> Linear -> ReLU -> Linear over a tile of rows."""
    x = x_ref[...].astype(jnp.float32)                       # (TM, D)

    # LayerNorm over last dim (matches nn.LayerNorm(latent_dim), eps=1e-5).
    # Always computed in f32 (v5e has no bf16 VPU/EUP).
    mean = jnp.mean(x, axis=-1, keepdims=True)
    var = jnp.mean(jnp.square(x - mean), axis=-1, keepdims=True)
    xn = (x - mean) * jax.lax.rsqrt(var + LN_EPS)
    xn = (xn * gamma_ref[...].astype(jnp.float32)
          + beta_ref[...].astype(jnp.float32))

    # Linear(D -> D) + ReLU.  MXU operands in the weight dtype (bf16 weights
    # -> bf16 MXU fast path), accumulation always in f32.
    w1 = w1_ref[...]
    h = jnp.dot(xn.astype(w1.dtype), w1, preferred_element_type=jnp.float32)
    h = jnp.maximum(h + b1_ref[...].astype(jnp.float32), 0.0)

    # Linear(D -> Fp).  Fp = out_features padded to a multiple of 128 so the
    # output block is lane-dense (unmasked stores); padded columns are zero
    # and sliced off in the wrapper.
    w2 = w2_ref[...]
    y = jnp.dot(h.astype(w2.dtype), w2, preferred_element_type=jnp.float32)
    y = y + b2_ref[...].astype(jnp.float32)

    o_ref[...] = y.astype(o_ref.dtype)


def _vmem_estimate(tm, D, Fp, x_itemsize, p_itemsize):
    """Rough per-step VMEM: double-buffered x/out, 2x params, f32 temps."""
    x_bytes = 2 * tm * D * x_itemsize
    o_bytes = 2 * tm * Fp * x_itemsize
    p_bytes = 2 * (3 * D + D * D + D * Fp + Fp) * p_itemsize
    tmp_bytes = tm * (2 * D + Fp) * 4
    return x_bytes + o_bytes + p_bytes + tmp_bytes


def output_process(x, params, *, tm=256, vmem_limit_bytes=48 * 1024 * 1024):
    """x: (..., latent_dim) -> (..., out_features). Fused Pallas kernel."""
    gamma, beta, w1, b1, w2, b2 = params
    D = x.shape[-1]
    F = w2.shape[-1]
    assert w1.shape == (D, D) and w2.shape[0] == D

    lead_shape = x.shape[:-1]
    x2d = x.reshape(-1, D)
    N = x2d.shape[0]

    # --- Lane-dense output: pad F to a multiple of 128 (zero columns). ---
    Fp = _round_up(F, _LANE)
    if Fp != F:
        w2 = jnp.pad(w2, ((0, 0), (0, Fp - F)))
        b2 = jnp.pad(b2, (0, Fp - F))

    # --- Row tile: as large as the VMEM budget allows, no divisibility req. ---
    x_item = jnp.dtype(x.dtype).itemsize
    p_item = jnp.dtype(w1.dtype).itemsize
    gran = 8 if x_item >= 4 else 16                 # sublane granularity
    tm_eff = max(gran, min(_round_up(tm, gran), _round_up(N, gran)))
    budget = int(0.6 * vmem_limit_bytes)
    while (tm_eff > gran and
           _vmem_estimate(tm_eff, D, Fp, x_item, p_item) > budget):
        tm_eff = max(gran, _round_up(tm_eff // 2, gran))
    # TODO(synk): for very large D (f32 w1 alone approaching VMEM, esp. v7x's
    # 64 MiB) add a K-tiled reduction grid axis (accumulator scratch +
    # pl.when init/finalize) and/or single-buffer the weight blocks
    # (pipeline_mode=pl.Buffered(1)) instead of keeping them whole in VMEM.

    Np = _round_up(N, tm_eff)
    if Np != N:
        x2d = jnp.pad(x2d, ((0, Np - N), (0, 0)))   # zero rows, sliced off below

    # Params broadcast as (1, D) / (1, Fp) rows to stay 2-D on TPU.
    gamma2 = gamma.reshape(1, D)
    beta2 = beta.reshape(1, D)
    b1_2 = b1.reshape(1, D)
    b2_2 = b2.reshape(1, Fp)

    grid = (Np // tm_eff,)
    const = lambda i: (0, 0)      # whole-array (resident) blocks for params

    out = pl.pallas_call(
        _output_process_kernel,
        out_shape=jax.ShapeDtypeStruct((Np, Fp), x.dtype),
        grid_spec=pltpu.PrefetchScalarGridSpec(
            num_scalar_prefetch=0,
            grid=grid,
            in_specs=[
                pl.BlockSpec((tm_eff, D), lambda i: (i, 0)),   # x row tile
                pl.BlockSpec((1, D), const),                   # gamma
                pl.BlockSpec((1, D), const),                   # beta
                pl.BlockSpec((D, D), const),                   # w1 (in, out)
                pl.BlockSpec((1, D), const),                   # b1
                pl.BlockSpec((D, Fp), const),                  # w2 (in, out)
                pl.BlockSpec((1, Fp), const),                  # b2
            ],
            out_specs=pl.BlockSpec((tm_eff, Fp), lambda i: (i, 0)),
        ),
        compiler_params=pltpu.CompilerParams(
            # Parallel row axis: shards across the 2 TensorCores on v7x,
            # neutral on v5e/v6e.
            dimension_semantics=("parallel",),
            vmem_limit_bytes=vmem_limit_bytes,
        ),
    )(x2d, gamma2, beta2, w1, b1_2, w2, b2_2)

    return out[:N, :F].reshape(*lead_shape, F)


def init_params(key, latent_dim, out_features, dtype=jnp.float32):
    """Deterministic synthetic params (shapes match the PyTorch module)."""
    k1, k2, k3, k4 = jax.random.split(key, 4)
    gamma = jnp.ones((latent_dim,), dtype)
    beta = jnp.zeros((latent_dim,), dtype)
    # PyTorch Linear stores W as (out, in); we keep it pre-transposed (in, out).
    w1 = (jax.random.normal(k1, (latent_dim, latent_dim), jnp.float32)
          / jnp.sqrt(latent_dim)).astype(dtype)
    b1 = (jax.random.normal(k2, (latent_dim,), jnp.float32) * 0.01).astype(dtype)
    w2 = (jax.random.normal(k3, (latent_dim, out_features), jnp.float32)
          / jnp.sqrt(latent_dim)).astype(dtype)
    b2 = (jax.random.normal(k4, (out_features,), jnp.float32) * 0.01).astype(dtype)
    return gamma, beta, w1, b1, w2, b2


def _reference(x, params):
    """Pure-JAX reference mirroring the kernel math (f32 LN + f32 accumulate,
    MXU operands in the weight dtype)."""
    gamma, beta, w1, b1, w2, b2 = params
    xf = x.astype(jnp.float32)
    mean = jnp.mean(xf, axis=-1, keepdims=True)
    var = jnp.mean(jnp.square(xf - mean), axis=-1, keepdims=True)
    xn = ((xf - mean) * jax.lax.rsqrt(var + LN_EPS) * gamma.astype(jnp.float32)
          + beta.astype(jnp.float32))
    h = jnp.dot(xn.astype(w1.dtype), w1, preferred_element_type=jnp.float32)
    h = jnp.maximum(h + b1.astype(jnp.float32), 0.0)
    y = jnp.dot(h.astype(w2.dtype), w2, preferred_element_type=jnp.float32)
    return (y + b2.astype(jnp.float32)).astype(x.dtype)


if __name__ == "__main__":
    seq, batch, latent_dim, out_features = 8, 2, 32, 16
    key = jax.random.PRNGKey(0)
    kx, kp = jax.random.split(key)
    x = jax.random.normal(kx, (seq, batch, latent_dim), jnp.float32)

    # f32 weights: must match the f32 reference tightly.
    params = init_params(kp, latent_dim, out_features, jnp.float32)
    y = jax.block_until_ready(output_process(x, params))
    y_ref = _reference(x, params)
    assert y.shape == (seq, batch, out_features)
    assert jnp.allclose(y, y_ref, atol=1e-4, rtol=1e-4), "f32 mismatch vs reference"

    # bf16 weights: exercises the bf16-operand MXU fast path (f32 accumulate).
    params_bf16 = tuple(p.astype(jnp.bfloat16) for p in params)
    y16 = jax.block_until_ready(output_process(x, params_bf16))
    y16_ref = _reference(x, params_bf16)
    assert y16.shape == (seq, batch, out_features)
    assert jnp.allclose(y16, y16_ref, atol=2e-2, rtol=2e-2), "bf16 mismatch vs reference"

    print("KERNEL_OK")
</pallas_src>

<mosaic_0001>
module attributes {stable_mosaic.version = 11 : i64} {
  func.func @_output_process_kernel(%arg0: i32, %arg1: memref<16x32xf32, #tpu.memory_space<vmem>>, %arg2: memref<1x32xf32, #tpu.memory_space<vmem>>, %arg3: memref<1x32xf32, #tpu.memory_space<vmem>>, %arg4: memref<32x32xf32, #tpu.memory_space<vmem>>, %arg5: memref<1x32xf32, #tpu.memory_space<vmem>>, %arg6: memref<32x128xf32, #tpu.memory_space<vmem>>, %arg7: memref<1x128xf32, #tpu.memory_space<vmem>>, %arg8: memref<16x128xf32, #tpu.memory_space<vmem>>) attributes {dimension_semantics = [#tpu.dimension_semantics<parallel>], iteration_bounds = array<i64: 1>, scalar_prefetch = 0 : i64, scratch_operands = 0 : i64, tpu.core_type = #tpu.core_type<tc>, window_params = [{transform_indices = @transform_0, window_bounds = array<i64: 16, 32>}, {pipeline_mode = #tpu.pipeline_mode<synchronous>, transform_indices = @transform_1, window_bounds = array<i64: 1, 32>}, {pipeline_mode = #tpu.pipeline_mode<synchronous>, transform_indices = @transform_2, window_bounds = array<i64: 1, 32>}, {pipeline_mode = #tpu.pipeline_mode<synchronous>, transform_indices = @transform_3, window_bounds = array<i64: 32, 32>}, {pipeline_mode = #tpu.pipeline_mode<synchronous>, transform_indices = @transform_4, window_bounds = array<i64: 1, 32>}, {pipeline_mode = #tpu.pipeline_mode<synchronous>, transform_indices = @transform_5, window_bounds = array<i64: 32, 128>}, {pipeline_mode = #tpu.pipeline_mode<synchronous>, transform_indices = @transform_6, window_bounds = array<i64: 1, 128>}, {transform_indices = @transform_7, window_bounds = array<i64: 16, 128>}]} {
    %c0 = arith.constant 0 : index
    %c0_0 = arith.constant 0 : index
    %0 = vector.load %arg1[%c0, %c0_0] : memref<16x32xf32, #tpu.memory_space<vmem>>, vector<16x32xf32>
    %cst = arith.constant dense<0.000000e+00> : vector<16xf32>
    %1 = vector.multi_reduction <add>, %0, %cst [1] : vector<16x32xf32> to vector<16xf32>
    %2 = vector.shape_cast %1 : vector<16xf32> to vector<16x1xf32>
    %cst_1 = arith.constant 3.200000e+01 : f32
    %3 = vector.broadcast %cst_1 : f32 to vector<16x1xf32>
    %4 = arith.divf %2, %3 : vector<16x1xf32>
    %5 = vector.broadcast %4 : vector<16x1xf32> to vector<16x32xf32>
    %6 = arith.subf %0, %5 : vector<16x32xf32>
    %7 = arith.mulf %6, %6 : vector<16x32xf32>
    %cst_2 = arith.constant dense<0.000000e+00> : vector<16xf32>
    %8 = vector.multi_reduction <add>, %7, %cst_2 [1] : vector<16x32xf32> to vector<16xf32>
    %9 = vector.shape_cast %8 : vector<16xf32> to vector<16x1xf32>
    %cst_3 = arith.constant 3.200000e+01 : f32
    %10 = vector.broadcast %cst_3 : f32 to vector<16x1xf32>
    %11 = arith.divf %9, %10 : vector<16x1xf32>
    %12 = vector.broadcast %4 : vector<16x1xf32> to vector<16x32xf32>
    %13 = arith.subf %0, %12 : vector<16x32xf32>
    %cst_4 = arith.constant 9.99999974E-6 : f32
    %14 = vector.broadcast %cst_4 : f32 to vector<16x1xf32>
    %15 = arith.addf %11, %14 : vector<16x1xf32>
    %16 = math.rsqrt %15 : vector<16x1xf32>
    %17 = vector.broadcast %16 : vector<16x1xf32> to vector<16x32xf32>
    %18 = arith.mulf %13, %17 : vector<16x32xf32>
    %c0_5 = arith.constant 0 : index
    %c0_6 = arith.constant 0 : index
    %19 = vector.load %arg2[%c0_5, %c0_6] : memref<1x32xf32, #tpu.memory_space<vmem>>, vector<1x32xf32>
    %20 = vector.broadcast %19 : vector<1x32xf32> to vector<16x32xf32>
    %21 = arith.mulf %18, %20 : vector<16x32xf32>
    %c0_7 = arith.constant 0 : index
    %c0_8 = arith.constant 0 : index
    %22 = vector.load %arg3[%c0_7, %c0_8] : memref<1x32xf32, #tpu.memory_space<vmem>>, vector<1x32xf32>
    %23 = vector.broadcast %22 : vector<1x32xf32> to vector<16x32xf32>
    %24 = arith.addf %21, %23 : vector<16x32xf32>
    %c0_9 = arith.constant 0 : index
    %c0_10 = arith.constant 0 : index
    %25 = vector.load %arg4[%c0_9, %c0_10] : memref<32x32xf32, #tpu.memory_space<vmem>>, vector<32x32xf32>
    %cst_11 = arith.constant dense<0.000000e+00> : vector<16x32xf32>
    %26 = tpu.matmul %24, %25, %cst_11 {dimension_numbers = #tpu.dot_dimension_numbers<[1], [0], [0], [1], [0, 0, 1, 1], [], []>} : vector<16x32xf32>, vector<32x32xf32>, vector<16x32xf32> -> vector<16x32xf32>
    %c0_12 = arith.constant 0 : index
    %c0_13 = arith.constant 0 : index
    %27 = vector.load %arg5[%c0_12, %c0_13] : memref<1x32xf32, #tpu.memory_space<vmem>>, vector<1x32xf32>
    %28 = vector.broadcast %27 : vector<1x32xf32> to vector<16x32xf32>
    %29 = arith.addf %26, %28 : vector<16x32xf32>
    %cst_14 = arith.constant 0.000000e+00 : f32
    %30 = vector.broadcast %cst_14 : f32 to vector<16x32xf32>
    %31 = arith.maximumf %29, %30 : vector<16x32xf32>
    %c0_15 = arith.constant 0 : index
    %c0_16 = arith.constant 0 : index
    %32 = vector.load %arg6[%c0_15, %c0_16] : memref<32x128xf32, #tpu.memory_space<vmem>>, vector<32x128xf32>
    %cst_17 = arith.constant dense<0.000000e+00> : vector<16x128xf32>
    %33 = tpu.matmul %31, %32, %cst_17 {dimension_numbers = #tpu.dot_dimension_numbers<[1], [0], [0], [1], [0, 0, 1, 1], [], []>} : vector<16x32xf32>, vector<32x128xf32>, vector<16x128xf32> -> vector<16x128xf32>
    %c0_18 = arith.constant 0 : index
    %c0_19 = arith.constant 0 : index
    %34 = vector.load %arg7[%c0_18, %c0_19] : memref<1x128xf32, #tpu.memory_space<vmem>>, vector<1x128xf32>
    %35 = vector.broadcast %34 : vector<1x128xf32> to vector<16x128xf32>
    %36 = arith.addf %33, %35 : vector<16x128xf32>
    %c0_20 = arith.constant 0 : index
    %c0_21 = arith.constant 0 : index
    %37 = vector.load %arg8[%c0_20, %c0_21] : memref<16x128xf32, #tpu.memory_space<vmem>>, vector<16x128xf32>
    tpu.vector_store %arg8[%c0_20, %c0_21], %36 {strides = array<i32>} : memref<16x128xf32, #tpu.memory_space<vmem>>, vector<16x128xf32>,
    return
  }
  func.func @transform_0(%arg0: i32) -> (i32, i32) {
    %c0_i32 = arith.constant 0 : i32
    %c0_i32_0 = arith.constant 0 : i32
    return %arg0, %c0_i32 : i32, i32
  }
  func.func @transform_1(%arg0: i32) -> (i32, i32) {
    %c0_i32 = arith.constant 0 : i32
    %c0_i32_0 = arith.constant 0 : i32
    %c0_i32_1 = arith.constant 0 : i32
    return %c0_i32, %c0_i32_0 : i32, i32
  }
  func.func @transform_2(%arg0: i32) -> (i32, i32) {
    %c0_i32 = arith.constant 0 : i32
    %c0_i32_0 = arith.constant 0 : i32
    %c0_i32_1 = arith.constant 0 : i32
    return %c0_i32, %c0_i32_0 : i32, i32
  }
  func.func @transform_3(%arg0: i32) -> (i32, i32) {
    %c0_i32 = arith.constant 0 : i32
    %c0_i32_0 = arith.constant 0 : i32
    %c0_i32_1 = arith.constant 0 : i32
    return %c0_i32, %c0_i32_0 : i32, i32
  }
  func.func @transform_4(%arg0: i32) -> (i32, i32) {
    %c0_i32 = arith.constant 0 : i32
    %c0_i32_0 = arith.constant 0 : i32
    %c0_i32_1 = arith.constant 0 : i32
    return %c0_i32, %c0_i32_0 : i32, i32
  }
  func.func @transform_5(%arg0: i32) -> (i32, i32) {
    %c0_i32 = arith.constant 0 : i32
    %c0_i32_0 = arith.constant 0 : i32
    %c0_i32_1 = arith.constant 0 : i32
    return %c0_i32, %c0_i32_0 : i32, i32
  }
  func.func @transform_6(%arg0: i32) -> (i32, i32) {
    %c0_i32 = arith.constant 0 : i32
    %c0_i32_0 = arith.constant 0 : i32
    %c0_i32_1 = arith.constant 0 : i32
    return %c0_i32, %c0_i32_0 : i32, i32
  }
  func.func @transform_7(%arg0: i32) -> (i32, i32) {
    %c0_i32 = arith.constant 0 : i32
    %c0_i32_0 = arith.constant 0 : i32
    return %arg0, %c0_i32 : i32, i32
  }
}

</mosaic_0001>

<bundles_post_ra>
// kernel: tpu_custom_call.1
= control target key start
LH: loop header
LB: loop body
LE: loop exit
PB: predicated region body
PF: predicated region fallthrough
CT: control target
= control target key end

     0   :  { %12 = vsyncpa [#allocation3], 0  ;;  %s617_s0 = inlined_call_operand.hbm [shape: f32[16,32], index: 0, kind: input, shape index: {}]   ;;  %s618_s1 = inlined_call_operand.vmem [shape: f32[1,32], index: 1, kind: input, shape index: {}]   ;;  %s619_s2 = inlined_call_operand.vmem [shape: f32[1,32], index: 2, kind: input, shape index: {}]   ;;  %s620_s3 = inlined_call_operand.hbm [shape: f32[32,32], index: 3, kind: input, shape index: {}]   ;;  %s621_s4 = inlined_call_operand.vmem [shape: f32[1,32], index: 4, kind: input, shape index: {}]   ;;  %s622_s5 = inlined_call_operand.hbm [shape: f32[32,128], index: 5, kind: input, shape index: {}]   ;;  %s623_s6 = inlined_call_operand.vmem [shape: f32[1,128], index: 6, kind: input, shape index: {}]   ;;  %s624_s7 = inlined_call_operand.hbm [shape: f32[16,128], index: 7, kind: output, shape index: {}]  }
   0x1   :  { %13 = vsyncpa [#allocation6], 0 }
   0x2   :  { %14 = vsyncpa [#allocation4], 0  ;;  %s484_s24 = smov [#allocation5]   ;;  %s485_s26 = smov [#allocation2]  }
   0x3   :  { %s36_s25 = sshll.u32 %s484_s24, 4  ;;  %s20_s27 = sshll.u32 %s485_s26, 4  ;;  %s37_s25 = int_to_ptr.vmem [resolvable:$true] %s36_s25  ;;  %s530_s27 = int_to_ptr.vmem [resolvable:$true] %s20_s27 }
   0x4   :  { %s390_s30 = scalar_lea.hbm %s620_s3, 512 }
   0x5   :  { %p391_p0 = scmp.ne.s32.totalorder %s620_s3, %s390_s30  ;;  %p394_p1 = scmp.lt.u32.totalorder %s390_s30, %s620_s3 }
   0x7   :  { %p396_p2 = pnand %p394_p1, %p391_p0 }
   0x9   :  { %399 = shalt.err (!%p396_p2)
}
   0xa   :  { %s400_s12 = scalar_lea.vmem %s37_s25, 512  ;;  %p405_p4 = scmp.lt.s32.totalorder %s37_s25, %s37_s25 }
   0xb   :  { %p401_p3 = scmp.ne.s32.totalorder %s37_s25, %s400_s12  ;;  %p406_p5 = scmp.lt.s32.totalorder %s400_s12, %s400_s12 }
   0xd   :  { %p407_p6 = por %p406_p5, %p405_p4 }
   0xf   :  { %p408_p7 = pnand %p407_p6, %p401_p3 }
  0x11   :  { %411 = shalt.err (!%p408_p7)
}
  0x12   :  { %s486_s13 = smov 128   ;;  %s487_s14 = smov 8  }
  0x13   :  { %42 = dma.hbm_to_vmem [thread:$0]  %s620_s3, 512, %s37_s25, [#allocation6], %s486_s13, %s486_s13, %s487_s14  }
  0x14   :  { %s412_s19 = scalar_lea.hbm %s617_s0, 256 }
  0x15   :  { %p413_p8 = scmp.ne.s32.totalorder %s617_s0, %s412_s19  ;;  %p416_p9 = scmp.lt.u32.totalorder %s412_s19, %s617_s0 }
  0x17   :  { %p418_p10 = pnand %p416_p9, %p413_p8 }
  0x19   :  { %421 = shalt.err (!%p418_p10)
}
  0x1a   :  { %s422_s24 = scalar_lea.vmem %s530_s27, 256  ;;  %p427_p12 = scmp.lt.s32.totalorder %s530_s27, %s530_s27 }
  0x1b   :  { %p423_p11 = scmp.ne.s32.totalorder %s530_s27, %s422_s24  ;;  %p428_p13 = scmp.lt.s32.totalorder %s422_s24, %s422_s24 }
  0x1d   :  { %p429_p0 = por %p428_p13, %p427_p12 }
  0x1f   :  { %p430_p1 = pnand %p429_p0, %p423_p11 }
  0x21   :  { %433 = shalt.err (!%p430_p1)
}
  0x22   :  { %26 = dma.hbm_to_vmem [thread:$0]  %s617_s0, 256, %s530_s27, [#allocation3], %s486_s13, %s486_s13, %s487_s14  }
  0x23   :  { %s488_s26 = smov [#allocation7]   ;;  %s434_s8 = scalar_lea.hbm %s622_s5, 512 }
  0x24   :  { %s50_s28 = sshll.u32 %s488_s26, 4  ;;  %p435_p2 = scmp.ne.s32.totalorder %s622_s5, %s434_s8  ;;  %s51_s28 = int_to_ptr.vmem [resolvable:$true] %s50_s28 }
  0x25   :  { %p438_p3 = scmp.lt.u32.totalorder %s434_s8, %s622_s5 }
  0x27   :  { %p440_p4 = pnand %p438_p3, %p435_p2 }
  0x29   :  { %443 = shalt.err (!%p440_p4)
}
  0x2a   :  { %s444_s15 = scalar_lea.vmem %s51_s28, 512  ;;  %p449_p6 = scmp.lt.s32.totalorder %s51_s28, %s51_s28 }
  0x2b   :  { %p445_p5 = scmp.ne.s32.totalorder %s51_s28, %s444_s15  ;;  %p450_p7 = scmp.lt.s32.totalorder %s444_s15, %s444_s15 }
  0x2d   :  { %p451_p8 = por %p450_p7, %p449_p6 }
  0x2f   :  { %p452_p9 = pnand %p451_p8, %p445_p5 }
  0x31   :  { %455 = shalt.err (!%p452_p9)
}
  0x32   :  { %56 = dma.hbm_to_vmem [thread:$0]  %s622_s5, 512, %s51_s28, [#allocation6], %s486_s13, %s486_s13, %s487_s14  }
  0x33   :  { %478 = dma.done.wait [#allocation3], 256  }
  0x34   :  { %479 = vsyncadd [#allocation3], 4294967040 }
  0x35   :  { %480 = dma.done.wait [#allocation6], 1024  }
  0x36   :  { %481 = vsyncadd [#allocation6], 4294966272  ;;  %vm70_vm0 = vcmask 261120   ;;  %v68_v0 = vld [vmem:[#allocation2] sm:$0xff]  ;;  %v69_v1 = vld [vmem:[#allocation2 + $0x8] sm:$0xff]  ;;  %s489_s21 = smov [#allocation8]  }
  0x37   :  { %v71_v2 = vsel %vm70_vm0, %v68_v0, 0.0  ;;  %v74_v3 = vsel %vm70_vm0, %v69_v1, 0.0  ;;  %v116_v14 = vld [vmem:[#allocation5] sm:$0xff]  ;;  %v117_v15 = vld [vmem:[#allocation5 + $0x8] sm:$0xff]  ;;  %v118_v16 = vld [vmem:[#allocation5 + $0x10] sm:$0xff]  ;;  %s309_s22 = sshll.u32 %s489_s21, 4  ;;  %s310_s22 = int_to_ptr.vmem [resolvable:$true] %s309_s22 }
  0x38   :  { %72 = vadd.xlane.f32.xlu0 %v71_v2  ;;  %v364_v17 = vpack.c.bf16 %v117_v15, %v116_v14  ;;  %v119_v18 = vld [vmem:[#allocation5 + $0x18] sm:$0xff]  ;;  %v210_v20 = vld [vmem:[#allocation7] sm:$0xff]  ;;  %v211_v21 = vld [vmem:[#allocation7 + $0x8] sm:$0xff]  ;;  %p461_p11 = scmp.lt.s32.totalorder %s310_s22, %s310_s22 }
  0x39   :  { %v368_v19 = vpack.c.bf16 %v119_v18, %v118_v16  ;;  %v372_v22 = vpack.c.bf16 %v211_v21, %v210_v20  ;;  %v322_v30 = vld [vmem:[%s618_s1] ss:$0 sm:$0xff]  ;;  %v213_v40 = vld [vmem:[#allocation7 + $0x18] sm:$0xff] }
  0x3a   :  { %365 = vmatprep.subr.bf16.mxu0 %v364_v17  ;;  %v323_v32 = vld [vmem:[%s619_s2] ss:$0 sm:$0xff] }
  0x3b   :  { %367 = vmatpush3.bf16.msra.mxu0 %v364_v17  ;;  %373 = vmatprep.subr.bf16.mxu1 %v372_v22  ;;  %v212_v39 = vld [vmem:[#allocation7 + $0x10] sm:$0xff] }
  0x3c   :  { %75 = vadd.xlane.f32.xlu0 %v74_v3  ;;  %369 = vmatprep.subr.bf16.mxu0 %v368_v19  ;;  %v376_v41 = vpack.c.bf16 %v213_v40, %v212_v39  ;;  %v324_v42 = vld [vmem:[%s621_s4] ss:$0 sm:$0xff]  ;;  %s456_s4 = scalar_lea.vmem %s310_s22, 256 }
  0x3d   :  { %375 = vmatpush3.bf16.msra.mxu1 %v372_v22  ;;  %v327_v49 = vld [vmem:[%s623_s6] ss:$0 sm:$0xff]  ;;  %p457_p10 = scmp.ne.s32.totalorder %s310_s22, %s456_s4  ;;  %p462_p12 = scmp.lt.s32.totalorder %s456_s4, %s456_s4 }
  0x3e   :  { %377 = vmatprep.subr.bf16.mxu1 %v376_v41 }
  0x3f   :  { %371 = vmatpush3.bf16.msra.mxu0 %v368_v19  ;;  %p463_p13 = por %p462_p12, %p461_p11 }
  0x41   :  { %379 = vmatpush3.bf16.msra.mxu1 %v376_v41  ;;  %p464_p0 = pnand %p463_p13, %p457_p10 }
  0xc5   :  { %v73_v4 = vpop.xlane.xlu0 %72 }
  0xc6   :  { %v78_v5 = vmul.f32 0.03125, %v73_v4 }
  0xc8   :  { %v80_v6 = vsub.f32 %v68_v0, %v78_v5 }
  0xc9   :  { %v76_v7 = vpop.xlane.xlu0 %75 }
  0xca   :  { %v79_v8 = vmul.f32 0.03125, %v76_v7  ;;  %v82_v9 = vmul.f32 %v80_v6, %v80_v6 }
  0xcc   :  { %v81_v10 = vsub.f32 %v69_v1, %v79_v8  ;;  %v84_v11 = vsel %vm70_vm0, %v82_v9, 0.0 }
  0xcd   :  { %85 = vadd.xlane.f32.xlu1 %v84_v11 }
  0xce   :  { %v83_v12 = vmul.f32 %v81_v10, %v81_v10 }
  0xd0   :  { %v87_v13 = vsel %vm70_vm0, %v83_v12, 0.0 }
  0xd1   :  { %88 = vadd.xlane.f32.xlu1 %v87_v13 }
 0x15a   :  { %v86_v23 = vpop.xlane.xlu1 %85 }
 0x15b   :  { %v90_v24 = vmul.f32 0.03125, %v86_v23 }
 0x15d   :  { %v92_v25 = vadd.f32 1e-05, %v90_v24 }
 0x15e   :  { %v89_v26 = vpop.xlane.xlu1 %88 }
 0x15f   :  { %386 = vrsqrt.f32 %v92_v25  ;;  %v91_v27 = vmul.f32 0.03125, %v89_v26 }
 0x161   :  { %v93_v28 = vadd.f32 1e-05, %v91_v27 }
 0x163   :  { %388 = vrsqrt.f32 %v93_v28 }
 0x169   :  { %v387_v29 = vpop.eup %386 }
 0x16a   :  { %v96_v31 = vmul.f32 %v387_v29, %v80_v6 }
 0x16c   :  { %v105_v33 = vmul.f32 %v322_v30, %v96_v31 }
 0x16d   :  { %v389_v34 = vpop.eup %388 }
 0x16e   :  { %v97_v35 = vmul.f32 %v389_v34, %v81_v10  ;;  %v114_v36 = vadd.f32 %v323_v32, %v105_v33 }
 0x170   :  { %v106_v37 = vmul.f32 %v322_v30, %v97_v35  ;;  %350 = vmatprep.mubr.msk.f32.mxu0 %vm70_vm0, %v114_v36 }
 0x172   :  { %v115_v38 = vadd.f32 %v323_v32, %v106_v37 }
 0x174   :  { %351 = vmatmul.mubr.msk.f32.vlgmr.msra.gmra.mrb[0].mxu0 %vm70_vm0, %v115_v38 }
 0x247   :  { %v352_v43 = vpop.f32.mrb[0].mxu0 }
 0x248   :  { %v205_v44 = vadd.f32 %v352_v43, %v324_v42  ;;  %v199_v45 = vpop.f32.mrb[1].mxu0 }
 0x249   :  { %v200_v46 = vadd.f32 %v324_v42, %v199_v45 }
 0x24a   :  { %v209_v48 = vmax.f32 %v205_v44, 0.0 }
 0x24b   :  { %v208_v47 = vmax.f32 %v200_v46, 0.0 }
 0x24d   :  { %361 = vmatprep.mubr.msk.f32.mxu1 %vm70_vm0, %v208_v47 }
 0x24e   :  { %362 = vmatmul.mubr.msk.f32.vlgmr.msra.gmra.mrb[0].mxu1 %vm70_vm0, %v209_v48 }
 0x321   :  { %v363_v50 = vpop.f32.mrb[0].mxu1 }
 0x322   :  { %v299_v51 = vadd.f32 %v363_v50, %v327_v49  ;;  %v293_v52 = vpop.f32.mrb[1].mxu1 }
 0x323   :  { %v294_v53 = vadd.f32 %v327_v49, %v293_v52 }
 0x324   :  { %303 = vst [vmem:[#allocation8 + $0x8] sm:$0xff] %v299_v51 }
 0x325   :  { %302 = vst [vmem:[#allocation8] sm:$0xff] %v294_v53 }
 0x326   :  { %467 = shalt.err (!%p464_p0)
}
 0x327   :  { %s468_s6 = scalar_lea.hbm %s624_s7, 256 }
 0x328   :  { %p469_p1 = scmp.ne.s32.totalorder %s624_s7, %s468_s6  ;;  %p472_p2 = scmp.lt.u32.totalorder %s468_s6, %s624_s7 }
 0x32a   :  { %p474_p3 = pnand %p472_p2, %p469_p1 }
 0x32c   :  { %477 = shalt.err (!%p474_p3)
}
 0x32d   :  { %315 = dma.vmem_to_hbm [thread:$0]  %s310_s22, 256, %s624_s7, [#allocation4], %s486_s13, %s486_s13, %s487_s14  }
 0x32e   :  { %482 = dma.done.wait [#allocation4], 256  }
 0x32f   :  { %483 = vsyncadd [#allocation4], 4294967040 }
 0x330   :  { %319 = vsyncpa [#allocation3], 1 }
 0x331   :  { %320 = vsyncpa [#allocation6], 1 }
 0x332   :  { %321 = vsyncpa [#allocation4], 1 }

</bundles_post_ra>
